<compile_context>
chip_gen: v5e
topology: v5e:2x2
jax: 0.10.0
libtpu: 0.0.40
codegen_flags: <defaults>
</compile_context>

<pallas_src>
import jax
import jax.numpy as jnp
from jax.experimental import pallas as pl
from jax.experimental.pallas import tpu as pltpu


# ----------------------------- Pallas kernels -----------------------------

def _score_kernel(dec_ref, enc_ref, o_ref):
    # dec_ref: (1, H)   enc_ref: (tS, H)   o_ref: (1, tS)
    # Single MXU contraction over H -> lane-dense (1, tS) scores.
    o_ref[...] = jax.lax.dot_general(
        dec_ref[...], enc_ref[...],
        dimension_numbers=(((1,), (1,)), ((), ())),
        preferred_element_type=jnp.float32,
    ).astype(o_ref.dtype)


def _concat_kernel(dec_ref, w_ref, v_ref, enc_ref, o_ref):
    # dec_ref: (1, H)  w_ref: (H, H)  v_ref: (1, H)  enc_ref: (tS, H)  o_ref: (1, tS)
    x = dec_ref[...] + enc_ref[...]                               # (tS, H), row broadcast
    # x @ W.T via contraction-dim selection: no in-kernel transpose of W.
    h = jnp.tanh(
        jax.lax.dot_general(
            x, w_ref[...],
            dimension_numbers=(((1,), (1,)), ((), ())),
            preferred_element_type=jnp.float32,
        )
    )                                                             # (tS, H) f32
    # v @ h.T -> lane-dense (1, tS) scores on the MXU.
    o_ref[...] = jax.lax.dot_general(
        v_ref[...].astype(jnp.float32), h,
        dimension_numbers=(((1,), (1,)), ((), ())),
        preferred_element_type=jnp.float32,
    ).astype(o_ref.dtype)


# ----------------------------- wrapper -----------------------------

def luong_attention(decoder_hidden, encoder_outputs, params=None, method="dot",
                    *, compute_dtype=None, seq_tile=512):
    """decoder_hidden: (1, H); encoder_outputs: (1, S, H). Returns f32 scores (1, S)."""
    H = decoder_hidden.shape[-1]
    if encoder_outputs.ndim == 3:
        # The PyTorch module's view(1, -1, 1) + bmm implicitly assumes batch == 1.
        assert encoder_outputs.shape[0] == 1, "kernel assumes batch=1"
    enc = encoder_outputs.reshape(-1, H)
    S = enc.shape[0]

    dec = decoder_hidden
    if method == "general":
        # Hoisted (1,H)@(H,H) projection: avoids recomputing it for every S tile
        # and keeping W resident in VMEM; the streaming kernel equals 'dot'.
        dec = jnp.dot(decoder_hidden, params["fc_w"].T,
                      preferred_element_type=jnp.float32,
                      precision=jax.lax.Precision.HIGHEST)

    if compute_dtype is not None:
        dec = dec.astype(compute_dtype)
        enc = enc.astype(compute_dtype)

    # --- sequence tiling: stream (tS, H) enc tiles, lane-dense (1, tS) outputs ---
    if S > seq_tile:
        t_s = seq_tile                          # multiple of 128 -> unmasked vst on output
        n_tiles = pl.cdiv(S, t_s)
        s_pad = n_tiles * t_s
        if s_pad != S:
            enc = jnp.pad(enc, ((0, s_pad - S), (0, 0)))
    else:
        t_s, n_tiles, s_pad = S, 1, S           # single block == full array dims

    dec_spec = pl.BlockSpec((1, H), lambda i: (0, 0))
    enc_spec = pl.BlockSpec((t_s, H), lambda i: (i, 0))
    out_spec = pl.BlockSpec((1, t_s), lambda i: (0, i))
    out_shape = jax.ShapeDtypeStruct((1, s_pad), jnp.float32)
    # NOTE(v7x): parallel S axis lets the 2 TCs split grid steps; the default
    # seq_tile=512 keeps double-buffered enc tiles well under the 64 MiB VMEM cap.
    cparams = pltpu.CompilerParams(dimension_semantics=("parallel",))

    def _nbytes(a):
        return int(a.size * a.dtype.itemsize)

    if method in ("dot", "general"):
        cost = pl.CostEstimate(flops=2 * s_pad * H, transcendentals=0,
                               bytes_accessed=_nbytes(dec) + _nbytes(enc) + 4 * s_pad)
        out = pl.pallas_call(
            _score_kernel,
            out_shape=out_shape,
            grid=(n_tiles,),
            in_specs=[dec_spec, enc_spec],
            out_specs=out_spec,
            compiler_params=cparams,
            cost_estimate=cost,
        )(dec, enc)
    elif method == "concat":
        W = params["fc_w"]
        v = params["weight"]
        if compute_dtype is not None:
            W = W.astype(compute_dtype)
            v = v.astype(compute_dtype)
        w_spec = pl.BlockSpec((H, H), lambda i: (0, 0))
        v_spec = pl.BlockSpec((1, H), lambda i: (0, 0))
        cost = pl.CostEstimate(
            flops=2 * s_pad * H * H + 3 * s_pad * H,
            transcendentals=s_pad * H,
            bytes_accessed=_nbytes(dec) + _nbytes(enc) + _nbytes(W) + _nbytes(v) + 4 * s_pad)
        out = pl.pallas_call(
            _concat_kernel,
            out_shape=out_shape,
            grid=(n_tiles,),
            in_specs=[dec_spec, w_spec, v_spec, enc_spec],
            out_specs=out_spec,
            compiler_params=cparams,
            cost_estimate=cost,
        )(dec, W, v, enc)
    else:
        raise ValueError(f"unknown method {method!r}")

    return out[:, :S] if s_pad != S else out


# ----------------------------- pure-JAX reference -----------------------------

def luong_attention_ref(decoder_hidden, encoder_outputs, params=None, method="dot"):
    hp = jax.lax.Precision.HIGHEST
    H = decoder_hidden.shape[-1]
    enc = encoder_outputs.reshape(-1, H).astype(jnp.float32)
    dec = decoder_hidden.astype(jnp.float32)
    if method == "dot":
        return jnp.einsum("bh,sh->bs", dec, enc, precision=hp)
    if method == "general":
        q = jnp.einsum("bh,oh->bo", dec, params["fc_w"].astype(jnp.float32), precision=hp)
        return jnp.einsum("bh,sh->bs", q, enc, precision=hp)
    if method == "concat":
        h = jnp.tanh(jnp.einsum("sh,oh->so", dec + enc,
                                params["fc_w"].astype(jnp.float32), precision=hp))
        return jnp.einsum("bh,sh->bs", params["weight"].astype(jnp.float32), h, precision=hp)
    raise ValueError(method)


# ----------------------------- main -----------------------------

if __name__ == "__main__":
    key = jax.random.PRNGKey(0)
    k_dec, k_enc, k_w, k_v, k_dec2, k_enc2, k_w2, k_v2 = jax.random.split(key, 8)

    ok = True

    def _check(tag, out, ref, atol, rtol):
        global ok
        if out.shape != ref.shape:
            ok = False
            print(f"MISMATCH {tag}: shape {out.shape} vs {ref.shape}")
            return
        if not bool(jnp.allclose(out, ref, atol=atol, rtol=rtol)):
            ok = False
            print(f"MISMATCH {tag}: max_abs_err={float(jnp.max(jnp.abs(out - ref)))}")

    # --- small, module-sized shapes: single-block path ---------------------
    H1, S1 = 32, 8
    dec1 = jax.random.normal(k_dec, (1, H1), jnp.float32)
    enc1 = jax.random.normal(k_enc, (1, S1, H1), jnp.float32)
    params1 = {
        "fc_w": 0.1 * jax.random.normal(k_w, (H1, H1), jnp.float32),
        "weight": 0.1 * jax.random.normal(k_v, (1, H1), jnp.float32),
    }
    for method in ("dot", "general", "concat"):
        out = jax.block_until_ready(luong_attention(dec1, enc1, params1, method=method))
        _check(f"small/{method}/f32", out,
               luong_attention_ref(dec1, enc1, params1, method=method), 2e-3, 2e-3)

    # --- larger shapes: exercises the S-tiled grid, padding and bf16 streaming ---
    H2, S2 = 128, 1300            # pads to 3 tiles of 512
    dec2 = jax.random.normal(k_dec2, (1, H2), jnp.float32)
    enc2 = jax.random.normal(k_enc2, (1, S2, H2), jnp.float32)
    params2 = {
        "fc_w": 0.05 * jax.random.normal(k_w2, (H2, H2), jnp.float32),
        "weight": 0.05 * jax.random.normal(k_v2, (1, H2), jnp.float32),
    }

    def _bf(x):
        return x.astype(jnp.bfloat16).astype(jnp.float32)

    for method in ("dot", "general", "concat"):
        ref = luong_attention_ref(dec2, enc2, params2, method=method)
        out = jax.block_until_ready(
            luong_attention(dec2, enc2, params2, method=method, seq_tile=512))
        _check(f"tiled/{method}/f32", out, ref, 2e-3, 2e-3)

        out_bf = jax.block_until_ready(
            luong_attention(dec2, enc2, params2, method=method, seq_tile=512,
                            compute_dtype=jnp.bfloat16))
        ref_bf = luong_attention_ref(_bf(dec2), _bf(enc2),
                                     {k: _bf(p) for k, p in params2.items()},
                                     method=method)
        _check(f"tiled/{method}/bf16", out_bf, ref_bf, 5e-2, 5e-2)

    if ok:
        print("KERNEL_OK")
</pallas_src>

<mosaic_0001>
module attributes {stable_mosaic.version = 11 : i64} {
  func.func @_score_kernel(%arg0: i32, %arg1: memref<1x32xf32, #tpu.memory_space<vmem>>, %arg2: memref<8x32xf32, #tpu.memory_space<vmem>>, %arg3: memref<1x8xf32, #tpu.memory_space<vmem>>) attributes {dimension_semantics = [#tpu.dimension_semantics<parallel>], iteration_bounds = array<i64: 1>, scalar_prefetch = 0 : i64, scratch_operands = 0 : i64, tpu.core_type = #tpu.core_type<tc>, window_params = [{pipeline_mode = #tpu.pipeline_mode<synchronous>, transform_indices = @transform_0, window_bounds = array<i64: 1, 32>}, {transform_indices = @transform_1, window_bounds = array<i64: 8, 32>}, {transform_indices = @transform_2, window_bounds = array<i64: 1, 8>}]} {
    %c0 = arith.constant 0 : index
    %c0_0 = arith.constant 0 : index
    %0 = vector.load %arg1[%c0, %c0_0] : memref<1x32xf32, #tpu.memory_space<vmem>>, vector<1x32xf32>
    %c0_1 = arith.constant 0 : index
    %c0_2 = arith.constant 0 : index
    %1 = vector.load %arg2[%c0_1, %c0_2] : memref<8x32xf32, #tpu.memory_space<vmem>>, vector<8x32xf32>
    %cst = arith.constant dense<0.000000e+00> : vector<1x8xf32>
    %2 = tpu.matmul %0, %1, %cst {dimension_numbers = #tpu.dot_dimension_numbers<[1], [1], [0], [0], [0, 0, 1, 0], [], []>} : vector<1x32xf32>, vector<8x32xf32>, vector<1x8xf32> -> vector<1x8xf32>
    %c0_3 = arith.constant 0 : index
    %c0_4 = arith.constant 0 : index
    %3 = vector.load %arg3[%c0_3, %c0_4] : memref<1x8xf32, #tpu.memory_space<vmem>>, vector<1x8xf32>
    tpu.vector_store %arg3[%c0_3, %c0_4], %2 {strides = array<i32>} : memref<1x8xf32, #tpu.memory_space<vmem>>, vector<1x8xf32>,
    return
  }
  func.func @transform_0(%arg0: i32) -> (i32, i32) {
    %c0_i32 = arith.constant 0 : i32
    %c0_i32_0 = arith.constant 0 : i32
    %c0_i32_1 = arith.constant 0 : i32
    return %c0_i32, %c0_i32_0 : i32, i32
  }
  func.func @transform_1(%arg0: i32) -> (i32, i32) {
    %c0_i32 = arith.constant 0 : i32
    %c0_i32_0 = arith.constant 0 : i32
    return %arg0, %c0_i32 : i32, i32
  }
  func.func @transform_2(%arg0: i32) -> (i32, i32) {
    %c0_i32 = arith.constant 0 : i32
    %c0_i32_0 = arith.constant 0 : i32
    return %c0_i32, %arg0 : i32, i32
  }
}

</mosaic_0001>

<bundles_post_ra>
// kernel: tpu_custom_call.1
= control target key start
LH: loop header
LB: loop body
LE: loop exit
PB: predicated region body
PF: predicated region fallthrough
CT: control target
= control target key end

     0   :  { %7 = vsyncpa [#allocation3], 0  ;;  %s199_s0 = inlined_call_operand.hbm [shape: f32[1,32], index: 0, kind: input, shape index: {}]   ;;  %s200_s1 = inlined_call_operand.hbm [shape: f32[8,32], index: 1, kind: input, shape index: {}]   ;;  %s201_s2 = inlined_call_operand.hbm [shape: f32[1,8], index: 2, kind: output, shape index: {}]  }
   0x1   :  { %8 = vsyncpa [#allocation6], 0 }
   0x2   :  { %9 = vsyncpa [#allocation4], 0  ;;  %s15_s11 = sshll.u32 %s199_s0, 4  ;;  %s172_s12 = smov [#allocation2]   ;;  %s16_s11 = int_to_ptr.hbm [resolvable:$true] %s15_s11 }
   0x3   :  { %s17_s13 = sshll.u32 %s172_s12, 4  ;;  %s26_s16 = sshll.u32 %s200_s1, 4  ;;  %s18_s13 = int_to_ptr.vmem [resolvable:$true] %s17_s13  ;;  %s27_s16 = int_to_ptr.hbm [resolvable:$true] %s26_s16 }
   0x4   :  { %20 = dma.hbm_to_vmem [thread:$0]  %s16_s11, 16, %s18_s13, [#allocation3]  }
   0x5   :  { %s173_s17 = smov [#allocation5]  }
   0x6   :  { %s28_s18 = sshll.u32 %s173_s17, 4  ;;  %s29_s18 = int_to_ptr.vmem [resolvable:$true] %s28_s18 }
   0x7   :  { %31 = dma.hbm_to_vmem [thread:$0]  %s27_s16, 128, %s29_s18, [#allocation6]  }
   0x8   :  { %166 = dma.done.wait [#allocation3], 16  }
   0x9   :  { %167 = vsyncadd [#allocation3], 4294967280 }
   0xa   :  { %168 = dma.done.wait [#allocation6], 128  }
   0xb   :  { %169 = vsyncadd [#allocation6], 4294967168  ;;  %vm42_vm0 = vcmask 261120   ;;  %v41_v0 = vld [vmem:[#allocation5] sm:$0xff]  ;;  %v40_v1 = vld [vmem:[#allocation2] sm:$0x1] }
   0xc   :  { %89 = vmatpush.xpose.msk.msra.mxu0 %vm42_vm0, %v41_v0  ;;  %s174_s0 = smov [#allocation7]   ;;  %s78_s1 = sshll.u32 %s201_s2, 4  ;;  %vm69_vm1 = vcmask 57344   ;;  %s79_s1 = int_to_ptr.hbm [resolvable:$true] %s78_s1 }
   0xd   :  { %s76_s19 = sshll.u32 %s174_s0, 4  ;;  %s77_s19 = int_to_ptr.vmem [resolvable:$true] %s76_s19 }
   0xf   :  { %90 = vmatmul.msk.f32.vlgmr.msra.gmra.mxu0 %vm42_vm0, %v40_v1 }
  0x8c   :  { %v66_v2 = vpop.f32.mrf.mxu0 }
  0x8d   :  { %70 = vst.msk [vmem:[#allocation7] sm:$0x1] %vm69_vm1, %v66_v2 }
  0x8e   :  { %81 = dma.vmem_to_hbm [thread:$0]  %s77_s19, 16, %s79_s1, [#allocation4]  }
  0x8f   :  { %170 = dma.done.wait [#allocation4], 16  }
  0x90   :  { %171 = vsyncadd [#allocation4], 4294967280 }
  0x91   :  { %86 = vsyncpa [#allocation3], 1 }
  0x92   :  { %87 = vsyncpa [#allocation6], 1 }
  0x93   :  { %88 = vsyncpa [#allocation4], 1 }

</bundles_post_ra>
